<compile_context>
chip_gen: v7x
topology: tpu7x:2x2x1
jax: 0.10.0
libtpu: 0.0.40
codegen_flags: <defaults>
</compile_context>

<pallas_src>
import functools

import jax
import jax.numpy as jnp
from jax.experimental import pallas as pl
from jax.experimental.pallas import tpu as pltpu

# Layer sizes fixed by the PyTorch module.
F_IN, H1, H2, F1, F2, F3 = 27, 60, 50, 40, 20, 4

# Row offsets inside the packed f32 weight slab (multiples of 8, the f32
# sublane tile, so every static slice starts tile-aligned).
OFF_W12, OFF_WBANK, OFF_WFA, OFF_WFB = 0, 32, 64, 120
W_SLAB_ROWS = 176


def _edge_predictor_kernel(idx_ref, adj_ref, x_ref, bank_ref, w_ref, b_ref,
                           out_ref, *, N, NB, M):
    dot = functools.partial(jnp.dot, preferred_element_type=jnp.float32)
    f32 = jnp.float32

    # --- GCN body (conv1∘conv2 folded; bias terms precomputed per node):
    #     h = A @ (A @ (x @ (W1 W2))) + node_bias
    xw = dot(x_ref[...], w_ref[pl.ds(OFF_W12, F_IN), :])            # (N, H2)
    a = adj_ref[...]                                                # (N, N)
    h = dot(a, dot(a, xw)) + b_ref[pl.ds(0, N), :]                  # (N, H2)

    # --- bank_fcn: Linear(27, 50)
    bk = (dot(bank_ref[...], w_ref[pl.ds(OFF_WBANK, F_IN), :])
          + b_ref[pl.ds(N, 1), :])                                  # (NB, H2)

    # --- gather rows of vstack((h, bank)) with one-hot MXU matmuls,
    #     split over the h / bank blocks (avoids a sublane concat).
    i1 = idx_ref[pl.ds(0, M), :]                                    # (M, 1) int32
    i2 = idx_ref[pl.ds(M, M), :]                                    # (M, 1) int32
    col_n = jax.lax.broadcasted_iota(jnp.int32, (M, N), 1)
    col_b = jax.lax.broadcasted_iota(jnp.int32, (M, NB), 1)
    g1 = (dot((col_n == i1).astype(f32), h)
          + dot((col_b == (i1 - N)).astype(f32), bk))               # (M, H2)
    g2 = (dot((col_n == i2).astype(f32), h)
          + dot((col_b == (i2 - N)).astype(f32), bk))               # (M, H2)

    # --- folded fc head (fc1∘fc2∘fc3, all linear):
    #     z = g1 @ (Wf1a Wf2 Wf3) + g2 @ (Wf1b Wf2 Wf3) + b_fold
    z = (dot(g1, w_ref[pl.ds(OFF_WFA, H2), pl.ds(0, F3)])
         + dot(g2, w_ref[pl.ds(OFF_WFB, H2), pl.ds(0, F3)])
         + b_ref[pl.ds(N + 1, 1), pl.ds(0, F3)])                    # (M, F3)

    # --- softmax(dim=0): normalize across the M query rows, per class column.
    mx = jnp.max(z, axis=0, keepdims=True)
    e = jnp.exp(z - mx)
    out_ref[...] = e * pl.reciprocal(jnp.sum(e, axis=0, keepdims=True),
                                     approx=False)


def gcn_norm_adj(edge_index, num_nodes):
    """Dense D^-1/2 (A + I) D^-1/2 (PyG GCNConv default norm; edge weights sum
    for duplicate edges, matching PyG's scatter-add)."""
    row, col = edge_index
    a = jnp.zeros((num_nodes, num_nodes), jnp.float32).at[row, col].add(1.0)
    a = a + jnp.eye(num_nodes, dtype=jnp.float32)
    deg = a.sum(axis=1)
    dinv = jnp.where(deg > 0, 1.0 / jnp.sqrt(deg), 0.0)
    return a * dinv[:, None] * dinv[None, :]


def fold_and_pack(adj, params):
    """One-time glue (per graph + params), hoisted out of the per-call path:
    fold conv biases, fold fc1∘fc2∘fc3, pack all parameters into two slabs."""
    n = adj.shape[0]

    w12 = params["w1"] @ params["w2"]                               # (27, 50)
    node_bias = (adj.sum(axis=1, keepdims=True) * (params["b1"] @ params["w2"])
                 + params["b2"])                                    # (N, 50)

    wf23 = params["wf2"] @ params["wf3"]                            # (40, 4)
    wfa = params["wf1"][:H2] @ wf23                                 # (50, 4)
    wfb = params["wf1"][H2:] @ wf23                                 # (50, 4)
    b_fold = (params["bf1"] @ wf23 + params["bf2"] @ params["wf3"]
              + params["bf3"])                                      # (1, 4)

    w_slab = jnp.zeros((W_SLAB_ROWS, H2), jnp.float32)
    w_slab = w_slab.at[OFF_W12:OFF_W12 + F_IN, :].set(w12)
    w_slab = w_slab.at[OFF_WBANK:OFF_WBANK + F_IN, :].set(params["wb"])
    w_slab = w_slab.at[OFF_WFA:OFF_WFA + H2, :F3].set(wfa)
    w_slab = w_slab.at[OFF_WFB:OFF_WFB + H2, :F3].set(wfb)

    b_rows = ((n + 2 + 7) // 8) * 8
    b_slab = jnp.zeros((b_rows, H2), jnp.float32)
    b_slab = b_slab.at[:n, :].set(node_bias)
    b_slab = b_slab.at[n, :].set(params["bb"][0])
    b_slab = b_slab.at[n + 1, :F3].set(b_fold[0])

    return w_slab, b_slab


@jax.jit
def edge_predictor_forward(idx, adj, x, bank, w_slab, b_slab):
    N = adj.shape[0]
    NB = bank.shape[0]
    M = idx.shape[0] // 2

    kernel = functools.partial(_edge_predictor_kernel, N=N, NB=NB, M=M)
    vmem = pl.BlockSpec(memory_space=pltpu.MemorySpace.VMEM)

    return pl.pallas_call(
        kernel,
        out_shape=jax.ShapeDtypeStruct((M, F3), jnp.float32),
        in_specs=[vmem] * 6,
        out_specs=vmem,
        cost_estimate=pl.CostEstimate(
            flops=150_000, transcendentals=64, bytes_accessed=48_000),
    )(idx, adj, x, bank, w_slab, b_slab)


def reference_forward(adj, x, bank, node1, node2, params):
    """Pure-JAX reference of the PyTorch forward (unfused)."""
    h = adj @ (x @ params["w1"]) + params["b1"]
    h = adj @ (h @ params["w2"]) + params["b2"]
    bk = bank @ params["wb"] + params["bb"]
    stacked = jnp.concatenate([h, bk], axis=0)
    cat = jnp.concatenate([stacked[node1], stacked[node2]], axis=1)
    z = cat @ params["wf1"] + params["bf1"]
    z = z @ params["wf2"] + params["bf2"]
    z = z @ params["wf3"] + params["bf3"]
    return jax.nn.softmax(z, axis=0)


if __name__ == "__main__":
    key = jax.random.PRNGKey(0)
    keys = jax.random.split(key, 16)

    N, NB, M = 16, 4, 8   # nodes, bank rows, query pairs

    # G.x and bank features
    x = jax.random.normal(keys[0], (N, F_IN), jnp.float32)
    bank = jax.random.normal(keys[1], (NB, F_IN), jnp.float32)

    # G.edge_index: ring graph, both directions
    src = jnp.arange(N, dtype=jnp.int32)
    dst = (src + 1) % N
    edge_index = jnp.stack(
        [jnp.concatenate([src, dst]), jnp.concatenate([dst, src])])
    adj = gcn_norm_adj(edge_index, N)

    # node1 / node2: indices into vstack((nodes, bank)) -> [0, N+NB)
    node1 = jax.random.randint(keys[2], (M,), 0, N + NB, dtype=jnp.int32)
    node2 = jax.random.randint(keys[3], (M,), 0, N + NB, dtype=jnp.int32)

    def w(k, shape, scale=0.1):
        return scale * jax.random.normal(k, shape, jnp.float32)

    # deterministic synthetic parameters ([in, out] layout; y = x @ W + b)
    params = dict(
        w1=w(keys[4], (F_IN, H1)),     b1=w(keys[5], (1, H1)),
        w2=w(keys[6], (H1, H2)),       b2=w(keys[7], (1, H2)),
        wb=w(keys[8], (F_IN, H2)),     bb=w(keys[9], (1, H2)),
        wf1=w(keys[10], (2 * H2, F1)), bf1=w(keys[11], (1, F1)),
        wf2=w(keys[12], (F1, F2)),     bf2=w(keys[13], (1, F2)),
        wf3=w(keys[14], (F2, F3)),     bf3=w(keys[15], (1, F3)),
    )

    # hoisted glue: parameter folding + packing, done once per (graph, params)
    w_slab, b_slab = fold_and_pack(adj, params)
    idx = jnp.concatenate([node1, node2]).astype(jnp.int32)[:, None]  # (2M, 1)

    out = edge_predictor_forward(idx, adj, x, bank, w_slab, b_slab)
    out = jax.block_until_ready(out)

    assert out.shape == (M, F3)
    assert bool(jnp.all(jnp.isfinite(out)))
    # softmax over dim=0: every output column sums to 1
    assert bool(jnp.allclose(out.sum(axis=0), 1.0, atol=1e-5))
    # matches the unfused pure-JAX reference of the PyTorch forward
    ref = reference_forward(adj, x, bank, node1, node2, params)
    assert bool(jnp.allclose(out, ref, atol=5e-3, rtol=5e-2))

    print("KERNEL_OK")
</pallas_src>

<mosaic_0001>
module attributes {stable_mosaic.version = 11 : i64} {
  func.func @_edge_predictor_kernel(%arg0: memref<16x1xi32, #tpu.memory_space<vmem>>, %arg1: memref<16x16xf32, #tpu.memory_space<vmem>>, %arg2: memref<16x27xf32, #tpu.memory_space<vmem>>, %arg3: memref<4x27xf32, #tpu.memory_space<vmem>>, %arg4: memref<176x50xf32, #tpu.memory_space<vmem>>, %arg5: memref<24x50xf32, #tpu.memory_space<vmem>>, %arg6: memref<8x4xf32, #tpu.memory_space<vmem>>) attributes {dimension_semantics = [], scalar_prefetch = 0 : i64, scratch_operands = 0 : i64, tpu.core_type = #tpu.core_type<tc>} {
    %c0 = arith.constant 0 : index
    %c0_0 = arith.constant 0 : index
    %0 = vector.load %arg2[%c0, %c0_0] : memref<16x27xf32, #tpu.memory_space<vmem>>, vector<16x27xf32>
    %c0_1 = arith.constant 0 : index
    %c0_2 = arith.constant 0 : index
    %1 = vector.load %arg4[%c0_1, %c0_2] : memref<176x50xf32, #tpu.memory_space<vmem>>, vector<27x50xf32>
    %cst = arith.constant dense<0.000000e+00> : vector<16x50xf32>
    %2 = tpu.matmul %0, %1, %cst {dimension_numbers = #tpu.dot_dimension_numbers<[1], [0], [0], [1], [0, 0, 1, 1], [], []>} : vector<16x27xf32>, vector<27x50xf32>, vector<16x50xf32> -> vector<16x50xf32>
    %c0_3 = arith.constant 0 : index
    %c0_4 = arith.constant 0 : index
    %3 = vector.load %arg1[%c0_3, %c0_4] : memref<16x16xf32, #tpu.memory_space<vmem>>, vector<16x16xf32>
    %cst_5 = arith.constant dense<0.000000e+00> : vector<16x50xf32>
    %4 = tpu.matmul %3, %2, %cst_5 {dimension_numbers = #tpu.dot_dimension_numbers<[1], [0], [0], [1], [0, 0, 1, 1], [], []>} : vector<16x16xf32>, vector<16x50xf32>, vector<16x50xf32> -> vector<16x50xf32>
    %cst_6 = arith.constant dense<0.000000e+00> : vector<16x50xf32>
    %5 = tpu.matmul %3, %4, %cst_6 {dimension_numbers = #tpu.dot_dimension_numbers<[1], [0], [0], [1], [0, 0, 1, 1], [], []>} : vector<16x16xf32>, vector<16x50xf32>, vector<16x50xf32> -> vector<16x50xf32>
    %c0_7 = arith.constant 0 : index
    %c0_8 = arith.constant 0 : index
    %6 = vector.load %arg5[%c0_7, %c0_8] : memref<24x50xf32, #tpu.memory_space<vmem>>, vector<16x50xf32>
    %7 = arith.addf %5, %6 : vector<16x50xf32>
    %c0_9 = arith.constant 0 : index
    %c0_10 = arith.constant 0 : index
    %8 = vector.load %arg3[%c0_9, %c0_10] : memref<4x27xf32, #tpu.memory_space<vmem>>, vector<4x27xf32>
    %c32 = arith.constant 32 : index
    %c0_11 = arith.constant 0 : index
    %9 = vector.load %arg4[%c32, %c0_11] : memref<176x50xf32, #tpu.memory_space<vmem>>, vector<27x50xf32>
    %cst_12 = arith.constant dense<0.000000e+00> : vector<4x50xf32>
    %10 = tpu.matmul %8, %9, %cst_12 {dimension_numbers = #tpu.dot_dimension_numbers<[1], [0], [0], [1], [0, 0, 1, 1], [], []>} : vector<4x27xf32>, vector<27x50xf32>, vector<4x50xf32> -> vector<4x50xf32>
    %c16 = arith.constant 16 : index
    %c0_13 = arith.constant 0 : index
    %11 = vector.load %arg5[%c16, %c0_13] : memref<24x50xf32, #tpu.memory_space<vmem>>, vector<1x50xf32>
    %12 = vector.broadcast %11 : vector<1x50xf32> to vector<4x50xf32>
    %13 = arith.addf %10, %12 : vector<4x50xf32>
    %c0_14 = arith.constant 0 : index
    %c0_15 = arith.constant 0 : index
    %14 = vector.load %arg0[%c0_14, %c0_15] : memref<16x1xi32, #tpu.memory_space<vmem>>, vector<8x1xi32>
    %c8 = arith.constant 8 : index
    %c0_16 = arith.constant 0 : index
    %15 = vector.load %arg0[%c8, %c0_16] : memref<16x1xi32, #tpu.memory_space<vmem>>, vector<8x1xi32>
    %16 = tpu.iota {dimensions = array<i32: 1>} : vector<8x16xi32>
    %17 = tpu.iota {dimensions = array<i32: 1>} : vector<8x4xi32>
    %18 = vector.broadcast %14 : vector<8x1xi32> to vector<8x16xi32>
    %19 = arith.cmpi eq, %16, %18 : vector<8x16xi32>
    %20 = arith.extui %19 : vector<8x16xi1> to vector<8x16xi32>
    %21 = arith.sitofp %20 : vector<8x16xi32> to vector<8x16xf32>
    %cst_17 = arith.constant dense<0.000000e+00> : vector<8x50xf32>
    %22 = tpu.matmul %21, %7, %cst_17 {dimension_numbers = #tpu.dot_dimension_numbers<[1], [0], [0], [1], [0, 0, 1, 1], [], []>} : vector<8x16xf32>, vector<16x50xf32>, vector<8x50xf32> -> vector<8x50xf32>
    %c16_i32 = arith.constant 16 : i32
    %23 = vector.broadcast %c16_i32 : i32 to vector<8x1xi32>
    %24 = arith.subi %14, %23 : vector<8x1xi32>
    %25 = vector.broadcast %24 : vector<8x1xi32> to vector<8x4xi32>
    %26 = arith.cmpi eq, %17, %25 : vector<8x4xi32>
    %27 = arith.extui %26 : vector<8x4xi1> to vector<8x4xi32>
    %28 = arith.sitofp %27 : vector<8x4xi32> to vector<8x4xf32>
    %cst_18 = arith.constant dense<0.000000e+00> : vector<8x50xf32>
    %29 = tpu.matmul %28, %13, %cst_18 {dimension_numbers = #tpu.dot_dimension_numbers<[1], [0], [0], [1], [0, 0, 1, 1], [], []>} : vector<8x4xf32>, vector<4x50xf32>, vector<8x50xf32> -> vector<8x50xf32>
    %30 = arith.addf %22, %29 : vector<8x50xf32>
    %31 = vector.broadcast %15 : vector<8x1xi32> to vector<8x16xi32>
    %32 = arith.cmpi eq, %16, %31 : vector<8x16xi32>
    %33 = arith.extui %32 : vector<8x16xi1> to vector<8x16xi32>
    %34 = arith.sitofp %33 : vector<8x16xi32> to vector<8x16xf32>
    %cst_19 = arith.constant dense<0.000000e+00> : vector<8x50xf32>
    %35 = tpu.matmul %34, %7, %cst_19 {dimension_numbers = #tpu.dot_dimension_numbers<[1], [0], [0], [1], [0, 0, 1, 1], [], []>} : vector<8x16xf32>, vector<16x50xf32>, vector<8x50xf32> -> vector<8x50xf32>
    %c16_i32_20 = arith.constant 16 : i32
    %36 = vector.broadcast %c16_i32_20 : i32 to vector<8x1xi32>
    %37 = arith.subi %15, %36 : vector<8x1xi32>
    %38 = vector.broadcast %37 : vector<8x1xi32> to vector<8x4xi32>
    %39 = arith.cmpi eq, %17, %38 : vector<8x4xi32>
    %40 = arith.extui %39 : vector<8x4xi1> to vector<8x4xi32>
    %41 = arith.sitofp %40 : vector<8x4xi32> to vector<8x4xf32>
    %cst_21 = arith.constant dense<0.000000e+00> : vector<8x50xf32>
    %42 = tpu.matmul %41, %13, %cst_21 {dimension_numbers = #tpu.dot_dimension_numbers<[1], [0], [0], [1], [0, 0, 1, 1], [], []>} : vector<8x4xf32>, vector<4x50xf32>, vector<8x50xf32> -> vector<8x50xf32>
    %43 = arith.addf %35, %42 : vector<8x50xf32>
    %c64 = arith.constant 64 : index
    %c0_22 = arith.constant 0 : index
    %44 = vector.load %arg4[%c64, %c0_22] : memref<176x50xf32, #tpu.memory_space<vmem>>, vector<50x4xf32>
    %cst_23 = arith.constant dense<0.000000e+00> : vector<8x4xf32>
    %45 = tpu.matmul %30, %44, %cst_23 {dimension_numbers = #tpu.dot_dimension_numbers<[1], [0], [0], [1], [0, 0, 1, 1], [], []>} : vector<8x50xf32>, vector<50x4xf32>, vector<8x4xf32> -> vector<8x4xf32>
    %c120 = arith.constant 120 : index
    %c0_24 = arith.constant 0 : index
    %46 = vector.load %arg4[%c120, %c0_24] : memref<176x50xf32, #tpu.memory_space<vmem>>, vector<50x4xf32>
    %cst_25 = arith.constant dense<0.000000e+00> : vector<8x4xf32>
    %47 = tpu.matmul %43, %46, %cst_25 {dimension_numbers = #tpu.dot_dimension_numbers<[1], [0], [0], [1], [0, 0, 1, 1], [], []>} : vector<8x50xf32>, vector<50x4xf32>, vector<8x4xf32> -> vector<8x4xf32>
    %48 = arith.addf %45, %47 : vector<8x4xf32>
    %c17 = arith.constant 17 : index
    %c0_26 = arith.constant 0 : index
    %49 = vector.load %arg5[%c17, %c0_26] : memref<24x50xf32, #tpu.memory_space<vmem>>, vector<1x4xf32>
    %50 = vector.broadcast %49 : vector<1x4xf32> to vector<8x4xf32>
    %51 = arith.addf %48, %50 : vector<8x4xf32>
    %cst_27 = arith.constant dense<0xFF800000> : vector<4xf32>
    %52 = vector.multi_reduction <maximumf>, %51, %cst_27 [0] : vector<8x4xf32> to vector<4xf32>
    %53 = vector.shape_cast %52 : vector<4xf32> to vector<1x4xf32>
    %54 = vector.broadcast %53 : vector<1x4xf32> to vector<8x4xf32>
    %55 = arith.subf %51, %54 : vector<8x4xf32>
    %56 = math.exp %55 : vector<8x4xf32>
    %cst_28 = arith.constant dense<0.000000e+00> : vector<4xf32>
    %57 = vector.multi_reduction <add>, %56, %cst_28 [0] : vector<8x4xf32> to vector<4xf32>
    %58 = vector.shape_cast %57 : vector<4xf32> to vector<1x4xf32>
    %59 = tpu.reciprocal %58 : vector<1x4xf32> -> vector<1x4xf32>
    %60 = vector.broadcast %59 : vector<1x4xf32> to vector<8x4xf32>
    %61 = arith.mulf %56, %60 : vector<8x4xf32>
    %c0_29 = arith.constant 0 : index
    %c0_30 = arith.constant 0 : index
    %62 = vector.load %arg6[%c0_29, %c0_30] : memref<8x4xf32, #tpu.memory_space<vmem>>, vector<8x4xf32>
    tpu.vector_store %arg6[%c0_29, %c0_30], %61 {strides = array<i32>} : memref<8x4xf32, #tpu.memory_space<vmem>>, vector<8x4xf32>,
    return
  }
}

</mosaic_0001>

<bundles_post_ra>
// kernel: edge_predictor_forward.1
= control target key start
LH: loop header
LB: loop body
LE: loop exit
PB: predicated region body
PF: predicated region fallthrough
CT: control target
= control target key end

     0   :  { %vm36_vm0 = vcmask 1042432   ;;  %vm29_vm1 = vcmask 220160   ;;  %vm1116_vm2 = vmmov 1   ;;  %vm117_vm4 = vcmask 130048   ;;  %s1316_s4 = inlined_call_operand.vmem [shape: f32[176,50], index: 4, kind: input, shape index: {}]   ;;  %s1317_s2 = inlined_call_operand.vmem [shape: f32[16,27], index: 2, kind: input, shape index: {}]   ;;  %s1318_s1 = inlined_call_operand.vmem [shape: f32[16,16], index: 1, kind: input, shape index: {}]   ;;  %s1319_s3 = inlined_call_operand.vmem [shape: f32[4,27], index: 3, kind: input, shape index: {}]   ;;  %s1320_s0 = inlined_call_operand.vmem [shape: s32[16,1], index: 0, kind: input, shape index: {}]   ;;  %s1321_s5 = inlined_call_operand.vmem [shape: f32[24,50], index: 5, kind: input, shape index: {}]   ;;  %s1322_s6 = inlined_call_operand.vmem [shape: f32[8,4], index: 6, kind: output, shape index: {}]  }
   0x1   :  { %v25_v0 = vld [vmem:[%s1316_s4] sm:$0xff]  ;;  %v26_v1 = vld [vmem:[%s1316_s4 + $0x8] sm:$0xff]  ;;  %v27_v2 = vld [vmem:[%s1316_s4 + $0x10] sm:$0xff]  ;;  %v1117_v12 = vmov 0.0|0.0   ;;  %vm1118_vm5 = vmmov 0   ;;  %v1119_v21 = vmov 0.0   ;;  %v364_v31 = vlaneseq }
   0x2   :  { %v1053_v3 = vpack.c.bf16 %v26_v1, %v25_v0  ;;  %v28_v4 = vld [vmem:[%s1316_s4 + $0x18] sm:$0x7]  ;;  %v23_v5 = vld [vmem:[%s1317_s2] sm:$0xff]  ;;  %vm1171_vm3 = vmpackc.low %vm36_vm0, %vm1116_vm2  ;;  %v1120_v23 = vmov 0   ;;  %vm383_vm7 = vcmask 1043456   ;;  %vm379_vm8 = vcmask 31744  }
   0x3   :  { %v1057_v6 = vpack.c.bf16 %v28_v4, %v27_v2  ;;  %967 = vmatprep.mubr.msk.f32.mxu0 %vm29_vm1, %v23_v5  ;;  %v24_v8 = vld [vmem:[%s1317_s2 + $0x8] sm:$0xff]  ;;  %v115_v9 = vld [vmem:[%s1318_s1] sm:$0xff]  ;;  %v279_v18 = vld [vmem:[%s1316_s4 + $0x30] sm:$0xff]  ;;  %1110 = vset.pattern.permute.xlu0 %v1120_v23  ;;  %v365_v32 = vand.u32 127, %v364_v31  ;;  %vm707_vm12 = vcmask 1041408   ;;  %vm703_vm13 = vcmask 408576  }
   0x4   :  { %1054 = vmatprep.subr.bf16.mxu0 %v1053_v3  ;;  %974 = vmatprep.mubr.msk.f32.mxu1 %vm117_vm4, %v115_v9  ;;  %v277_v10 = vld [vmem:[%s1316_s4 + $0x20] sm:$0xff]  ;;  %v278_v11 = vld [vmem:[%s1316_s4 + $0x28] sm:$0xff]  ;;  %v280_v19 = vld [vmem:[%s1316_s4 + $0x38] sm:$0x7] }
   0x5   :  { %1056 = vmatpush3.bf16.msra.mxu0 %v1053_v3  ;;  %v1072_v13 = vpack.c.bf16 %v278_v11, %v277_v10  ;;  %v116_v17 = vld [vmem:[%s1318_s1 + $0x8] sm:$0xff]  ;;  %v1075_v20 = vpack.c.bf16 %v280_v19, %v279_v18  ;;  %v276_v22 = vld [vmem:[%s1319_s3] sm:$0xf]  ;;  %1111 = vset.pattern.permute.xlu1 %v1120_v23  ;;  %v894_v33 = vld [vmem:[%s1321_s5 + $0x10] ss:$0 sm:$0xff] }
   0x6   :  { %1059 = vmatprep.subr.msk.bf16.mxu0 %vm1171_vm3, %v1057_v6  ;;  %v362_v24 = vld [vmem:[%s1320_s0] sm:$0xff]  ;;  %v363_v25 = vld [vmem:[%s1320_s0 + $0x8] sm:$0xff]  ;;  %v696_v53 = vld [vmem:[%s1316_s4 + $0x78] sm:$0xff] }
   0x7   :  { %v898_v26 = vadd.s32 4294967280, %v362_v24  ;;  %531 = vperm.xlu1 %1111, %v363_v25   ;;  %v904_v27 = vadd.s32 4294967280, %v363_v25  ;;  %v200_v39 = vld [vmem:[%s1321_s5 + $0x8] sm:$0xff]  ;;  %v199_v40 = vld [vmem:[%s1321_s5] sm:$0xff]  ;;  %v691_v56 = vld [vmem:[%s1316_s4 + $0x50] sm:$0xff] }
   0x8   :  { %v689_v48 = vld [vmem:[%s1316_s4 + $0x40] sm:$0xff]  ;;  %v690_v49 = vld [vmem:[%s1316_s4 + $0x48] sm:$0xff]  ;;  %v692_v57 = vld [vmem:[%s1316_s4 + $0x58] sm:$0xff] }
   0x9   :  { %1062 = vmatpush3.bf16.msk.msra.mxu0 %vm1171_vm3, %v1057_v6  ;;  %374 = vperm.xlu0 %1110, %v898_v26   ;;  %v1094_v52 = vpack.c.bf16 %v690_v49, %v689_v48  ;;  %v697_v54 = vld [vmem:[%s1316_s4 + $0x80] sm:$0xff]  ;;  %v1097_v59 = vpack.c.bf16 %v692_v57, %v691_v56  ;;  %v698_v60 = vld [vmem:[%s1316_s4 + $0x88] sm:$0xff]  ;;  %v699_v61 = vld [vmem:[%s1316_s4 + $0x90] sm:$0xff] }
   0xa   :  { %1071 = vmatprep.subr.bf16.mxu0 %v1117_v12  ;;  %v1085_v58 = vpack.c.bf16 %v697_v54, %v696_v53  ;;  %v693_v63 = vld [vmem:[%s1316_s4 + $0x60] sm:$0xff]  ;;  %v694_v0 = vld [vmem:[%s1316_s4 + $0x68] sm:$0xff]  ;;  %v1088_v1 = vpack.c.bf16 %v699_v61, %v698_v60  ;;  %v695_v3 = vld [vmem:[%s1316_s4 + $0x70] sm:$0x3] }
   0xb   :  { %538 = vperm.xlu1 %1111, %v904_v27   ;;  %v1100_v2 = vpack.c.bf16 %v694_v0, %v693_v63  ;;  %v700_v4 = vld [vmem:[%s1316_s4 + $0x98] sm:$0xff]  ;;  %v701_v5 = vld [vmem:[%s1316_s4 + $0xa0] sm:$0xff]  ;;  %v702_v7 = vld [vmem:[%s1316_s4 + $0xa8] sm:$0x3] }
   0xc   :  { %968 = vmatmul.mubr.msk.f32.vlgmr.msra.gmra.mrb[0].mxu0 %vm29_vm1, %v24_v8  ;;  %v1091_v6 = vpack.c.bf16 %v701_v5, %v700_v4  ;;  %v913_v18 = vld [vmem:[%s1321_s5 + $0x11] ss:$0 sm:$0xff] }
   0xd   :  { %1073 = vmatpush3.bf16.msra.mxu0 %v1072_v13  ;;  %992 = vmatprep.mubr.msk.f32.mxu0 %vm1118_vm5, %v1119_v21 }
   0xe   :  { %1074 = vmatprep.subr.bf16.mxu0 %v1117_v12  ;;  %367 = vperm.xlu0 %1110, %v362_v24  }
  0x11   :  { %1077 = vmatpush3.bf16.msk.msra.mxu0 %vm1171_vm3, %v1075_v20 }
  0x12   :  { %1081 = vmatprep.subr.bf16.mxu0 %v1117_v12 }
  0x14   :  { %993 = vmatmul.mubr.msk.f32.vlgmr.msra.gmra.mrb[2].mxu0 %vm29_vm1, %v276_v22 }
  0x15   :  { %1016 = vmatprep.mubr.msk.f32.mxu0 %vm1118_vm5, %v1119_v21 }
  0x86   :  { %v532_v42 = vpop.permute.xlu1 %531 }
  0x87   :  { %vm533_vm9 = vcmp.eq.s32.totalorder %v365_v32, %v532_v42 }
  0x88   :  { %v375_v34 = vpop.permute.xlu0 %374  ;;  %v903_v50 = vsel %vm533_vm9, 1.0, %v1119_v21 }
  0x89   :  { %vm376_vm6 = vcmp.eq.s32.totalorder %v365_v32, %v375_v34 }
  0x8a   :  { %v899_v38 = vsel %vm376_vm6, 1.0, %v1119_v21  ;;  %v539_v51 = vpop.permute.xlu1 %538 }
  0x8b   :  { %vm540_vm11 = vcmp.eq.s32.totalorder %v365_v32, %v539_v51 }
  0x8c   :  { %v905_v62 = vsel %vm540_vm11, 1.0, %v1119_v21 }
  0x8d   :  { %v368_v46 = vpop.permute.xlu0 %367 }
  0x8e   :  { %vm369_vm10 = vcmp.eq.s32.totalorder %v365_v32, %v368_v46 }
  0x8f   :  { %v897_v55 = vsel %vm369_vm10, 1.0, %v1119_v21 }
  0xdf   :  { %v969_v14 = vpop.f32.mrb[0].mxu0 }
  0xe0   :  { %v106_v15 = vpop.f32.mrb[1].mxu0 }
  0xe1   :  { %v1063_v16 = vpack.c.bf16 %v969_v14, %v106_v15 }
  0xe3   :  { %1064 = vmatprep.subr.bf16.mxu1 %v1063_v16 }
  0xe4   :  { %1066 = vmatpush3.bf16.msra.mxu1 %v1063_v16 }
  0xe7   :  { %975 = vmatmul.mubr.msk.f32.vlgmr.msra.gmra.mrb[0].mxu1 %vm117_vm4, %v116_v17  ;;  %v358_v35 = vpop.f32.mrb[2].mxu0 }
  0xe8   :  { %981 = vmatprep.mubr.msk.f32.mxu1 %vm117_vm4, %v115_v9  ;;  %v359_v36 = vadd.f32 %v894_v33, %v358_v35  ;;  %v994_v37 = vpop.f32.mrb[3].mxu0 }
 0x1ba   :  { %v976_v28 = vpop.f32.mrb[0].mxu1 }
 0x1bb   :  { %v190_v29 = vpop.f32.mrb[1].mxu1 }
 0x1bc   :  { %v1067_v30 = vpack.c.bf16 %v976_v28, %v190_v29 }
 0x1be   :  { %1068 = vmatprep.subr.bf16.mxu1 %v1067_v30 }
 0x1bf   :  { %1070 = vmatpush3.bf16.msra.mxu1 %v1067_v30 }
 0x1c0   :  { %995 = vmatprep.subr.mxu1 %v1119_v21 }
 0x1c2   :  { %982 = vmatmul.mubr.msk.f32.vlgmr.msra.gmra.mrb[2].mxu1 %vm117_vm4, %v116_v17 }
 0x1c3   :  { %997 = vmatprep.mubr.msk.f32.mxu1 %vm1118_vm5, %v1119_v21  ;;  %996 = vmatpush3.msk.msra.mxu1 %vm383_vm7, %v359_v36 }
 0x1c4   :  { %1078 = vmatprep.subr.bf16.mxu1 %v1117_v12 }
 0x1c6   :  { %998 = vmatmul.mubr.msk.f32.vlgmr.msra.gmra.mrb[4].mxu1 %vm379_vm8, %v899_v38 }
 0x1c7   :  { %1004 = vmatprep.mubr.msk.f32.mxu1 %vm1118_vm5, %v1119_v21 }
 0x295   :  { %v983_v41 = vpop.f32.mrb[2].mxu1 }
 0x296   :  { %v273_v43 = vadd.f32 %v983_v41, %v200_v39  ;;  %v267_v44 = vpop.f32.mrb[3].mxu1 }
 0x297   :  { %v268_v45 = vadd.f32 %v267_v44, %v199_v40 }
 0x299   :  { %v1079_v47 = vpack.c.bf16 %v273_v43, %v268_v45 }
 0x29b   :  { %1083 = vmatpush3.bf16.msra.mxu0 %v1079_v47  ;;  %1080 = vmatpush3.bf16.msra.mxu1 %v1079_v47 }
 0x29c   :  { %1007 = vmatprep.subr.mxu1 %v1119_v21  ;;  %1093 = vmatprep.subr.bf16.mxu0 %v1117_v12 }
 0x29e   :  { %1005 = vmatmul.mubr.msk.f32.vlgmr.msra.gmra.mrb[4].mxu1 %vm117_vm4, %v897_v55  ;;  %1017 = vmatmul.mubr.msk.f32.vlgmr.msra.gmra.mrb[4].mxu0 %vm117_vm4, %v903_v50 }
 0x29f   :  { %1008 = vmatpush3.msk.msra.mxu1 %vm383_vm7, %v359_v36  ;;  %1009 = vmatprep.mubr.msk.f32.mxu1 %vm1118_vm5, %v1119_v21 }
 0x2a0   :  { %1095 = vmatpush3.bf16.msra.mxu0 %v1094_v52  ;;  %1084 = vmatprep.subr.bf16.mxu1 %v1117_v12 }
 0x2a1   :  { %1096 = vmatprep.subr.bf16.mxu0 %v1117_v12  ;;  %1050 = vmatprep.mubr.msk.f32.mxu0 %vm1118_vm5, %v1119_v21 }
 0x2a2   :  { %1010 = vmatmul.mubr.msk.f32.vlgmr.msra.gmra.mrb[6].mxu1 %vm379_vm8, %v905_v62 }
 0x2a3   :  { %1086 = vmatpush3.bf16.msra.mxu1 %v1085_v58  ;;  %1033 = vmatprep.mubr.msk.f32.mxu1 %vm1118_vm5, %v1119_v21 }
 0x2a4   :  { %1098 = vmatpush3.bf16.msra.mxu0 %v1097_v59  ;;  %1087 = vmatprep.subr.bf16.mxu1 %v1117_v12 }
 0x2a5   :  { %1099 = vmatprep.subr.bf16.mxu0 %v1117_v12 }
 0x2a7   :  { %1089 = vmatpush3.bf16.msra.mxu1 %v1088_v1 }
 0x2a8   :  { %1101 = vmatpush3.bf16.msra.mxu0 %v1100_v2  ;;  %1090 = vmatprep.subr.bf16.mxu1 %v1117_v12 }
 0x2a9   :  { %1048 = vmatprep.subr.mxu0 %v1119_v21 }
 0x2ab   :  { %1092 = vmatpush3.bf16.msra.mxu1 %v1091_v6 }
 0x2ac   :  { %1049 = vmatpush3.msk.msra.mxu0 %vm707_vm12, %v695_v3  ;;  %1031 = vmatprep.subr.mxu1 %v1119_v21 }
 0x2af   :  { %1032 = vmatpush3.msk.msra.mxu1 %vm707_vm12, %v702_v7 }
 0x371   :  { %v526_v8 = vpop.f32.mrb[4].mxu1  ;;  %v685_v9 = vpop.f32.mrb[4].mxu0 }
 0x372   :  { %v1006_v10 = vpop.f32.mrb[5].mxu1  ;;  %1051 = vmatmul.mubr.msk.f32.vlgmr.msra.gmra.mrb[6].mxu0 %vm703_vm13, %v526_v8  ;;  %v1018_v11 = vpop.f32.mrb[5].mxu0 }
 0x375   :  { %v612_v12 = vpop.f32.mrb[6].mxu1 }
 0x376   :  { %v686_v13 = vadd.f32 %v685_v9, %v612_v12  ;;  %v1011_v14 = vpop.f32.mrb[7].mxu1 }
 0x378   :  { %1034 = vmatmul.mubr.msk.f32.vlgmr.msra.gmra.mrb[8].mxu1 %vm703_vm13, %v686_v13 }
 0x445   :  { %v853_v15 = vpop.f32.mrb[6].mxu0 }
 0x446   :  { %v1052_v16 = vpop.f32.mrb[7].mxu0 }
 0x44b   :  { %v777_v17 = vpop.f32.mrb[8].mxu1 }
 0x44c   :  { %v854_v19 = vadd.f32 %v853_v15, %v777_v17  ;;  %v1035_v20 = vpop.f32.mrb[9].mxu1 }
 0x44e   :  { %v862_v21 = vadd.f32 %v913_v18, %v854_v19 }
 0x450   :  { %v863_v22 = vsel %vm379_vm8, %v862_v21, -inf }
 0x451   :  { %v864_v23 = vrot.slane %v863_v22, 4 }
 0x453   :  { %v865_v24 = vmax.f32 %v863_v22, %v864_v23 }
 0x455   :  { %v866_v25 = vrot.slane %v865_v24, 2 }
 0x457   :  { %v867_v26 = vmax.f32 %v865_v24, %v866_v25 }
 0x459   :  { %v868_v27 = vrot.slane %v867_v26, 1 }
 0x45b   :  { %v869_v28 = vmax.f32 %v867_v26, %v868_v27 }
 0x45d   :  { %v870_v29 = vsub.f32 %v862_v21, %v869_v28 }
 0x45f   :  { %v871_v30 = vmul.f32 1.442695, %v870_v29 }
 0x461   :  { %1112 = vpow2.f32 %v871_v30 }
 0x46b   :  { %v1113_v31 = vpop.eup %1112 }
 0x46c   :  { %v873_v32 = vsel %vm379_vm8, %v1113_v31, 0.0 }
 0x46d   :  { %v874_v33 = vrot.slane %v873_v32, 4 }
 0x46f   :  { %v875_v34 = vadd.f32 %v874_v33, %v873_v32 }
 0x471   :  { %v876_v35 = vrot.slane %v875_v34, 2 }
 0x473   :  { %v877_v36 = vadd.f32 %v876_v35, %v875_v34 }
 0x475   :  { %v878_v37 = vrot.slane %v877_v36, 1 }
 0x477   :  { %v879_v38 = vadd.f32 %v878_v37, %v877_v36 }
 0x479   :  { %1114 = vrcp.f32 %v879_v38 }
 0x483   :  { %v1115_v39 = vpop.eup %1114 }
 0x484   :  { %v881_v40 = vmul.f32 %v1115_v39, %v1113_v31 }
 0x486   :  { %882 = vst.msk [vmem:[%s1322_s6] sm:$0xff] %vm379_vm8, %v881_v40 }

</bundles_post_ra>
